<compile_context>
chip_gen: v6e
topology: v6e:2x2x1
jax: 0.10.0
libtpu: 0.0.40
codegen_flags: <defaults>
</compile_context>

<pallas_src>
import functools

import jax
import jax.numpy as jnp
from jax.experimental import pallas as pl
from jax.experimental.pallas import tpu as pltpu


def _res_lstm2_kernel(B, skip,
                      x_ref, wih1_ref, whh1_ref, b1_ref, w2_ref, b2_ref,
                      y_ref,
                      gx_scr, hh_scr, c1_scr, c2_scr):
    """Fused 2-layer LSTM + skip over one time chunk.

    x_ref   : (Tc*B, F)   time-major rows (row = t*B + b), f32
    wih1_ref: (F, 4H)     layer-1 input->gates weight   (compute dtype)
    whh1_ref: (H, 4H)     layer-1 hidden->gates weight  (compute dtype)
    b1_ref  : (1, 4H)     layer-1 combined bias (b_ih + b_hh), f32
    w2_ref  : (2H, 4H)    layer-2 stacked [W_ih2^T ; W_hh2^T] (compute dtype)
    b2_ref  : (1, 4H)     layer-2 combined bias, f32
    y_ref   : (Tc*B, H)   output rows, f32
    gx_scr  : (Tc*B, 4H)  hoisted layer-1 input-projection gates (VMEM, f32)
    hh_scr  : (B, 2H)     persistent [h1 | h2] hidden state (VMEM, f32)
    c1_scr  : (B, H)      persistent layer-1 cell state
    c2_scr  : (B, H)      persistent layer-2 cell state
    Gate order matches PyTorch: [i, f, g, o].
    """
    rows, _ = x_ref.shape            # rows = Tc * B
    H = whh1_ref.shape[0]
    Tc = rows // B
    cd = wih1_ref.dtype              # MXU operand dtype (bf16 or f32)

    # Reset recurrent state at the start of the sequence (first time chunk only);
    # state persists in VMEM scratch across subsequent (sequential) chunks.
    @pl.when(pl.program_id(0) == 0)
    def _():
        hh_scr[...] = jnp.zeros_like(hh_scr)
        c1_scr[...] = jnp.zeros_like(c1_scr)
        c2_scr[...] = jnp.zeros_like(c2_scr)

    # Hoisted, MXU-friendly input projection for layer 1 over the whole chunk:
    # one (Tc*B, F) @ (F, 4H) matmul with the combined bias folded in once.
    gx_scr[...] = (
        jnp.dot(x_ref[...].astype(cd), wih1_ref[...],
                preferred_element_type=jnp.float32)
        + b1_ref[...]
    )

    def gate_update(gates, c_prev):
        # Gate elementwise math stays in f32 (v5e has no bf16 VPU/EUP).
        i_g = jax.nn.sigmoid(gates[:, 0 * H:1 * H])
        f_g = jax.nn.sigmoid(gates[:, 1 * H:2 * H])
        g_g = jnp.tanh(gates[:, 2 * H:3 * H])
        o_g = jax.nn.sigmoid(gates[:, 3 * H:4 * H])
        c_new = f_g * c_prev + i_g * g_g
        h_new = o_g * jnp.tanh(c_new)
        return h_new, c_new

    # Sequential recurrence over the chunk, entirely in VMEM.
    @pl.loop(0, Tc)
    def _(t):
        r0 = t * B

        # ---- layer 1: only the recurrent matmul remains in the loop ----
        h1_prev = hh_scr[:, 0:H]
        g1 = gx_scr[pl.ds(r0, B), :] + jnp.dot(
            h1_prev.astype(cd), whh1_ref[...], preferred_element_type=jnp.float32)
        h1_new, c1_new = gate_update(g1, c1_scr[...])
        hh_scr[:, 0:H] = h1_new
        c1_scr[...] = c1_new

        # ---- layer 2: input + recurrent matmuls fused into one MXU push ----
        # hh_scr now holds [h1_t | h2_{t-1}] -> (B, 2H) @ (2H, 4H).
        g2 = jnp.dot(hh_scr[...].astype(cd), w2_ref[...],
                     preferred_element_type=jnp.float32) + b2_ref[...]
        h2_new, c2_new = gate_update(g2, c2_scr[...])
        hh_scr[:, H:2 * H] = h2_new
        c2_scr[...] = c2_new

        y_ref[pl.ds(r0, B), :] = h2_new.astype(y_ref.dtype)

    if skip:
        # Whole-chunk skip add (F == H); single contiguous writeback per chunk.
        y_ref[...] = y_ref[...] + x_ref[...].astype(y_ref.dtype)


def res_lstm_forward(x_bft, params, skip=True, compute_dtype=jnp.bfloat16,
                     time_chunk=None):
    """ResLSTM forward. x_bft: [B, F, T] -> [B, F, T]."""
    assert len(params) == 2, "fused kernel implements the default num_layers=2"
    B, F, T = x_bft.shape
    (w_ih1, w_hh1, b_ih1, b_hh1), (w_ih2, w_hh2, b_ih2, b_hh2) = params
    H = w_hh1.shape[1]
    assert H == F, "unidirectional ResLSTM has hidden == dimension"

    # Time-major, then flatten (T, B) -> rows so the kernel is fully 2-D.
    x_tbf = jnp.transpose(x_bft, (2, 0, 1)).astype(jnp.float32)   # (T, B, F)
    x2d = x_tbf.reshape(T * B, F)

    # Pre-pack PyTorch-shaped weights ((4H, in), gate order i,f,g,o).
    wih1 = jnp.transpose(w_ih1).astype(compute_dtype)             # (F, 4H)
    whh1 = jnp.transpose(w_hh1).astype(compute_dtype)             # (H, 4H)
    b1 = (b_ih1 + b_hh1).reshape(1, -1).astype(jnp.float32)       # (1, 4H)
    w2 = jnp.concatenate(
        [jnp.transpose(w_ih2), jnp.transpose(w_hh2)], axis=0
    ).astype(compute_dtype)                                       # (2H, 4H)
    b2 = (b_ih2 + b_hh2).reshape(1, -1).astype(jnp.float32)       # (1, 4H)

    # For small T a single grid step keeps the whole sequence resident in VMEM;
    # for long sequences, pick a chunk (time_chunk*B rows should be a multiple of 8).
    if time_chunk is None:
        time_chunk = T
    assert T % time_chunk == 0
    num_chunks = T // time_chunk
    rows = time_chunk * B

    kernel = functools.partial(_res_lstm2_kernel, B, skip)

    y2d = pl.pallas_call(
        kernel,
        out_shape=jax.ShapeDtypeStruct((T * B, H), jnp.float32),
        grid_spec=pltpu.PrefetchScalarGridSpec(
            num_scalar_prefetch=0,
            grid=(num_chunks,),
            in_specs=[
                pl.BlockSpec((rows, F), lambda c: (c, 0)),        # x chunk
                pl.BlockSpec((F, 4 * H), lambda c: (0, 0)),       # W_ih1
                pl.BlockSpec((H, 4 * H), lambda c: (0, 0)),       # W_hh1
                pl.BlockSpec((1, 4 * H), lambda c: (0, 0)),       # bias 1
                pl.BlockSpec((2 * H, 4 * H), lambda c: (0, 0)),   # stacked W2
                pl.BlockSpec((1, 4 * H), lambda c: (0, 0)),       # bias 2
            ],
            out_specs=pl.BlockSpec((rows, H), lambda c: (c, 0)),
            scratch_shapes=[
                pltpu.VMEM((rows, 4 * H), jnp.float32),   # hoisted layer-1 gates
                pltpu.VMEM((B, 2 * H), jnp.float32),      # [h1 | h2] hidden state
                pltpu.VMEM((B, H), jnp.float32),          # c1
                pltpu.VMEM((B, H), jnp.float32),          # c2
            ],
        ),
        compiler_params=pltpu.CompilerParams(
            # Chunk axis carries the recurrence -> must stay sequential.
            dimension_semantics=("arbitrary",),
        ),
    )(x2d, wih1, whh1, b1, w2, b2)

    y_tbf = y2d.reshape(T, B, H)
    return jnp.transpose(y_tbf, (1, 2, 0))                         # (B, F, T)


def res_lstm_reference(x_bft, params, skip=True):
    """Pure-JAX (f32, PyTorch-faithful) reference using lax.scan."""
    x_tbf = jnp.transpose(x_bft, (2, 0, 1)).astype(jnp.float32)
    y = x_tbf
    for (w_ih, w_hh, b_ih, b_hh) in params:
        H = w_hh.shape[1]
        B = y.shape[1]

        def step(carry, x_t, w_ih=w_ih, w_hh=w_hh, b_ih=b_ih, b_hh=b_hh, H=H):
            h, c = carry
            gates = x_t @ w_ih.T + h @ w_hh.T + b_ih + b_hh
            i = jax.nn.sigmoid(gates[:, 0 * H:1 * H])
            f = jax.nn.sigmoid(gates[:, 1 * H:2 * H])
            g = jnp.tanh(gates[:, 2 * H:3 * H])
            o = jax.nn.sigmoid(gates[:, 3 * H:4 * H])
            c = f * c + i * g
            h = o * jnp.tanh(c)
            return (h, c), h

        init = (jnp.zeros((B, H), jnp.float32), jnp.zeros((B, H), jnp.float32))
        _, y = jax.lax.scan(step, init, y)
    if skip:
        y = y + x_tbf
    return jnp.transpose(y, (1, 2, 0))


def init_params(key, dimension, num_layers=2):
    """Deterministic LSTM params with PyTorch shapes (gate order i,f,g,o)."""
    H = dimension
    scale = 1.0 / jnp.sqrt(jnp.float32(H))
    params = []
    for _ in range(num_layers):
        in_dim = dimension  # unidirectional: every layer's input size = dimension
        key, k1, k2, k3, k4 = jax.random.split(key, 5)
        w_ih = jax.random.uniform(k1, (4 * H, in_dim), jnp.float32, -scale, scale)
        w_hh = jax.random.uniform(k2, (4 * H, H), jnp.float32, -scale, scale)
        b_ih = jax.random.uniform(k3, (4 * H,), jnp.float32, -scale, scale)
        b_hh = jax.random.uniform(k4, (4 * H,), jnp.float32, -scale, scale)
        params.append((w_ih, w_hh, b_ih, b_hh))
    return params


if __name__ == "__main__":
    B, F, T = 2, 32, 8  # x: [B, F, T]
    key = jax.random.PRNGKey(0)
    key, kx = jax.random.split(key)
    x = jax.random.normal(kx, (B, F, T), jnp.float32)
    params = init_params(key, dimension=F, num_layers=2)

    y_ref = res_lstm_reference(x, params, skip=True)

    # Full-f32 kernel: tight check against the pure-JAX reference.
    y_f32 = jax.block_until_ready(
        res_lstm_forward(x, params, skip=True, compute_dtype=jnp.float32))
    assert y_f32.shape == (B, F, T)
    assert jnp.allclose(y_f32, y_ref, atol=1e-4, rtol=1e-4), "f32 mismatch vs reference"

    # bf16-matmul fast path (f32 accumulation + f32 gate math): looser tolerance.
    y_bf16 = jax.block_until_ready(
        res_lstm_forward(x, params, skip=True, compute_dtype=jnp.bfloat16))
    assert y_bf16.shape == (B, F, T)
    assert jnp.allclose(y_bf16, y_ref, atol=3e-2, rtol=3e-2), "bf16 mismatch vs reference"

    print("KERNEL_OK")
</pallas_src>

<mosaic_0001>
module attributes {stable_mosaic.version = 11 : i64} {
  func.func @_res_lstm2_kernel(%arg0: i32, %arg1: memref<16x32xf32, #tpu.memory_space<vmem>>, %arg2: memref<32x128xf32, #tpu.memory_space<vmem>>, %arg3: memref<32x128xf32, #tpu.memory_space<vmem>>, %arg4: memref<1x128xf32, #tpu.memory_space<vmem>>, %arg5: memref<64x128xf32, #tpu.memory_space<vmem>>, %arg6: memref<1x128xf32, #tpu.memory_space<vmem>>, %arg7: memref<16x32xf32, #tpu.memory_space<vmem>>, %arg8: memref<16x128xf32, #tpu.memory_space<vmem>>, %arg9: memref<2x64xf32, #tpu.memory_space<vmem>>, %arg10: memref<2x32xf32, #tpu.memory_space<vmem>>, %arg11: memref<2x32xf32, #tpu.memory_space<vmem>>) attributes {dimension_semantics = [#tpu.dimension_semantics<arbitrary>], iteration_bounds = array<i64: 1>, scalar_prefetch = 0 : i64, scratch_operands = 4 : i64, tpu.core_type = #tpu.core_type<tc>, window_params = [{transform_indices = @transform_0, window_bounds = array<i64: 16, 32>}, {pipeline_mode = #tpu.pipeline_mode<synchronous>, transform_indices = @transform_1, window_bounds = array<i64: 32, 128>}, {pipeline_mode = #tpu.pipeline_mode<synchronous>, transform_indices = @transform_2, window_bounds = array<i64: 32, 128>}, {pipeline_mode = #tpu.pipeline_mode<synchronous>, transform_indices = @transform_3, window_bounds = array<i64: 1, 128>}, {pipeline_mode = #tpu.pipeline_mode<synchronous>, transform_indices = @transform_4, window_bounds = array<i64: 64, 128>}, {pipeline_mode = #tpu.pipeline_mode<synchronous>, transform_indices = @transform_5, window_bounds = array<i64: 1, 128>}, {transform_indices = @transform_6, window_bounds = array<i64: 16, 32>}]} {
    %c0_i32 = arith.constant 0 : i32
    %0 = arith.cmpi eq, %arg0, %c0_i32 : i32
    %1 = arith.extui %0 : i1 to i32
    %c0_i32_0 = arith.constant 0 : i32
    %2 = arith.cmpi ne, %1, %c0_i32_0 : i32
    scf.if %2 {
      %cst_16 = arith.constant 0.000000e+00 : f32
      %15 = vector.broadcast %cst_16 : f32 to vector<2x64xf32>
      %c0_17 = arith.constant 0 : index
      %c0_18 = arith.constant 0 : index
      %16 = vector.load %arg9[%c0_17, %c0_18] : memref<2x64xf32, #tpu.memory_space<vmem>>, vector<2x64xf32>
      tpu.vector_store %arg9[%c0_17, %c0_18], %15 {strides = array<i32>} : memref<2x64xf32, #tpu.memory_space<vmem>>, vector<2x64xf32>,
      %cst_19 = arith.constant 0.000000e+00 : f32
      %17 = vector.broadcast %cst_19 : f32 to vector<2x32xf32>
      %c0_20 = arith.constant 0 : index
      %c0_21 = arith.constant 0 : index
      %18 = vector.load %arg10[%c0_20, %c0_21] : memref<2x32xf32, #tpu.memory_space<vmem>>, vector<2x32xf32>
      tpu.vector_store %arg10[%c0_20, %c0_21], %17 {strides = array<i32>} : memref<2x32xf32, #tpu.memory_space<vmem>>, vector<2x32xf32>,
      %cst_22 = arith.constant 0.000000e+00 : f32
      %19 = vector.broadcast %cst_22 : f32 to vector<2x32xf32>
      %c0_23 = arith.constant 0 : index
      %c0_24 = arith.constant 0 : index
      %20 = vector.load %arg11[%c0_23, %c0_24] : memref<2x32xf32, #tpu.memory_space<vmem>>, vector<2x32xf32>
      tpu.vector_store %arg11[%c0_23, %c0_24], %19 {strides = array<i32>} : memref<2x32xf32, #tpu.memory_space<vmem>>, vector<2x32xf32>,
    } else {
    }
    %c0 = arith.constant 0 : index
    %c0_1 = arith.constant 0 : index
    %3 = vector.load %arg1[%c0, %c0_1] : memref<16x32xf32, #tpu.memory_space<vmem>>, vector<16x32xf32>
    %c0_2 = arith.constant 0 : index
    %c0_3 = arith.constant 0 : index
    %4 = vector.load %arg2[%c0_2, %c0_3] : memref<32x128xf32, #tpu.memory_space<vmem>>, vector<32x128xf32>
    %cst = arith.constant dense<0.000000e+00> : vector<16x128xf32>
    %5 = tpu.matmul %3, %4, %cst {dimension_numbers = #tpu.dot_dimension_numbers<[1], [0], [0], [1], [0, 0, 1, 1], [], []>} : vector<16x32xf32>, vector<32x128xf32>, vector<16x128xf32> -> vector<16x128xf32>
    %c0_4 = arith.constant 0 : index
    %c0_5 = arith.constant 0 : index
    %6 = vector.load %arg4[%c0_4, %c0_5] : memref<1x128xf32, #tpu.memory_space<vmem>>, vector<1x128xf32>
    %7 = vector.broadcast %6 : vector<1x128xf32> to vector<16x128xf32>
    %8 = arith.addf %5, %7 : vector<16x128xf32>
    %c0_6 = arith.constant 0 : index
    %c0_7 = arith.constant 0 : index
    %9 = vector.load %arg8[%c0_6, %c0_7] : memref<16x128xf32, #tpu.memory_space<vmem>>, vector<16x128xf32>
    tpu.vector_store %arg8[%c0_6, %c0_7], %8 {strides = array<i32>} : memref<16x128xf32, #tpu.memory_space<vmem>>, vector<16x128xf32>,
    %c0_i32_8 = arith.constant 0 : i32
    %c8_i32 = arith.constant 8 : i32
    %10 = arith.addi %c0_i32_8, %c8_i32 : i32
    %c1_i32 = arith.constant 1 : i32
    scf.for %arg12 = %c0_i32_8 to %10 step %c1_i32  : i32 {
      %c1_i32_16 = arith.constant 1 : i32
      %15 = arith.muli %arg12, %c1_i32_16 : i32
      %c0_i32_17 = arith.constant 0 : i32
      %16 = arith.addi %c0_i32_17, %15 : i32
      %c2_i32 = arith.constant 2 : i32
      %17 = arith.muli %16, %c2_i32 : i32
      %c0_18 = arith.constant 0 : index
      %c0_19 = arith.constant 0 : index
      %18 = vector.load %arg9[%c0_18, %c0_19] : memref<2x64xf32, #tpu.memory_space<vmem>>, vector<2x32xf32>
      %19 = arith.index_cast %17 : i32 to index
      %c0_20 = arith.constant 0 : index
      %20 = vector.load %arg8[%19, %c0_20] : memref<16x128xf32, #tpu.memory_space<vmem>>, vector<2x128xf32>
      %c0_21 = arith.constant 0 : index
      %c0_22 = arith.constant 0 : index
      %21 = vector.load %arg3[%c0_21, %c0_22] : memref<32x128xf32, #tpu.memory_space<vmem>>, vector<32x128xf32>
      %cst_23 = arith.constant dense<0.000000e+00> : vector<2x128xf32>
      %22 = tpu.matmul %18, %21, %cst_23 {dimension_numbers = #tpu.dot_dimension_numbers<[1], [0], [0], [1], [0, 0, 1, 1], [], []>} : vector<2x32xf32>, vector<32x128xf32>, vector<2x128xf32> -> vector<2x128xf32>
      %23 = arith.addf %20, %22 : vector<2x128xf32>
      %c0_24 = arith.constant 0 : index
      %c0_25 = arith.constant 0 : index
      %24 = vector.load %arg10[%c0_24, %c0_25] : memref<2x32xf32, #tpu.memory_space<vmem>>, vector<2x32xf32>
      %25 = vector.extract_strided_slice %23 {offsets = [0, 0], sizes = [2, 32], strides = [1, 1]} : vector<2x128xf32> to vector<2x32xf32>
      %26 = arith.negf %25 : vector<2x32xf32>
      %27 = math.exp %26 : vector<2x32xf32>
      %cst_26 = arith.constant 1.000000e+00 : f32
      %28 = vector.broadcast %cst_26 : f32 to vector<2x32xf32>
      %29 = arith.addf %28, %27 : vector<2x32xf32>
      %30 = arith.divf %28, %29 : vector<2x32xf32>
      %31 = vector.extract_strided_slice %23 {offsets = [0, 32], sizes = [2, 32], strides = [1, 1]} : vector<2x128xf32> to vector<2x32xf32>
      %32 = arith.negf %31 : vector<2x32xf32>
      %33 = math.exp %32 : vector<2x32xf32>
      %cst_27 = arith.constant 1.000000e+00 : f32
      %34 = vector.broadcast %cst_27 : f32 to vector<2x32xf32>
      %35 = arith.addf %34, %33 : vector<2x32xf32>
      %36 = arith.divf %34, %35 : vector<2x32xf32>
      %37 = vector.extract_strided_slice %23 {offsets = [0, 64], sizes = [2, 32], strides = [1, 1]} : vector<2x128xf32> to vector<2x32xf32>
      %38 = math.tanh %37 : vector<2x32xf32>
      %39 = vector.extract_strided_slice %23 {offsets = [0, 96], sizes = [2, 32], strides = [1, 1]} : vector<2x128xf32> to vector<2x32xf32>
      %40 = arith.negf %39 : vector<2x32xf32>
      %41 = math.exp %40 : vector<2x32xf32>
      %cst_28 = arith.constant 1.000000e+00 : f32
      %42 = vector.broadcast %cst_28 : f32 to vector<2x32xf32>
      %43 = arith.addf %42, %41 : vector<2x32xf32>
      %44 = arith.divf %42, %43 : vector<2x32xf32>
      %45 = arith.mulf %36, %24 : vector<2x32xf32>
      %46 = arith.mulf %30, %38 : vector<2x32xf32>
      %47 = arith.addf %45, %46 : vector<2x32xf32>
      %48 = math.tanh %47 : vector<2x32xf32>
      %49 = arith.mulf %44, %48 : vector<2x32xf32>
      %c0_29 = arith.constant 0 : index
      %c0_30 = arith.constant 0 : index
      %50 = vector.load %arg9[%c0_29, %c0_30] : memref<2x64xf32, #tpu.memory_space<vmem>>, vector<2x32xf32>
      tpu.vector_store %arg9[%c0_29, %c0_30], %49 {strides = array<i32>} : memref<2x64xf32, #tpu.memory_space<vmem>>, vector<2x32xf32>,
      %c0_31 = arith.constant 0 : index
      %c0_32 = arith.constant 0 : index
      %51 = vector.load %arg10[%c0_31, %c0_32] : memref<2x32xf32, #tpu.memory_space<vmem>>, vector<2x32xf32>
      tpu.vector_store %arg10[%c0_31, %c0_32], %47 {strides = array<i32>} : memref<2x32xf32, #tpu.memory_space<vmem>>, vector<2x32xf32>,
      %c0_33 = arith.constant 0 : index
      %c0_34 = arith.constant 0 : index
      %52 = vector.load %arg9[%c0_33, %c0_34] : memref<2x64xf32, #tpu.memory_space<vmem>>, vector<2x64xf32>
      %c0_35 = arith.constant 0 : index
      %c0_36 = arith.constant 0 : index
      %53 = vector.load %arg5[%c0_35, %c0_36] : memref<64x128xf32, #tpu.memory_space<vmem>>, vector<64x128xf32>
      %cst_37 = arith.constant dense<0.000000e+00> : vector<2x128xf32>
      %54 = tpu.matmul %52, %53, %cst_37 {dimension_numbers = #tpu.dot_dimension_numbers<[1], [0], [0], [1], [0, 0, 1, 1], [], []>} : vector<2x64xf32>, vector<64x128xf32>, vector<2x128xf32> -> vector<2x128xf32>
      %c0_38 = arith.constant 0 : index
      %c0_39 = arith.constant 0 : index
      %55 = vector.load %arg6[%c0_38, %c0_39] : memref<1x128xf32, #tpu.memory_space<vmem>>, vector<1x128xf32>
      %56 = vector.broadcast %55 : vector<1x128xf32> to vector<2x128xf32>
      %57 = arith.addf %54, %56 : vector<2x128xf32>
      %c0_40 = arith.constant 0 : index
      %c0_41 = arith.constant 0 : index
      %58 = vector.load %arg11[%c0_40, %c0_41] : memref<2x32xf32, #tpu.memory_space<vmem>>, vector<2x32xf32>
      %59 = vector.extract_strided_slice %57 {offsets = [0, 0], sizes = [2, 32], strides = [1, 1]} : vector<2x128xf32> to vector<2x32xf32>
      %60 = arith.negf %59 : vector<2x32xf32>
      %61 = math.exp %60 : vector<2x32xf32>
      %cst_42 = arith.constant 1.000000e+00 : f32
      %62 = vector.broadcast %cst_42 : f32 to vector<2x32xf32>
      %63 = arith.addf %62, %61 : vector<2x32xf32>
      %64 = arith.divf %62, %63 : vector<2x32xf32>
      %65 = vector.extract_strided_slice %57 {offsets = [0, 32], sizes = [2, 32], strides = [1, 1]} : vector<2x128xf32> to vector<2x32xf32>
      %66 = arith.negf %65 : vector<2x32xf32>
      %67 = math.exp %66 : vector<2x32xf32>
      %cst_43 = arith.constant 1.000000e+00 : f32
      %68 = vector.broadcast %cst_43 : f32 to vector<2x32xf32>
      %69 = arith.addf %68, %67 : vector<2x32xf32>
      %70 = arith.divf %68, %69 : vector<2x32xf32>
      %71 = vector.extract_strided_slice %57 {offsets = [0, 64], sizes = [2, 32], strides = [1, 1]} : vector<2x128xf32> to vector<2x32xf32>
      %72 = math.tanh %71 : vector<2x32xf32>
      %73 = vector.extract_strided_slice %57 {offsets = [0, 96], sizes = [2, 32], strides = [1, 1]} : vector<2x128xf32> to vector<2x32xf32>
      %74 = arith.negf %73 : vector<2x32xf32>
      %75 = math.exp %74 : vector<2x32xf32>
      %cst_44 = arith.constant 1.000000e+00 : f32
      %76 = vector.broadcast %cst_44 : f32 to vector<2x32xf32>
      %77 = arith.addf %76, %75 : vector<2x32xf32>
      %78 = arith.divf %76, %77 : vector<2x32xf32>
      %79 = arith.mulf %70, %58 : vector<2x32xf32>
      %80 = arith.mulf %64, %72 : vector<2x32xf32>
      %81 = arith.addf %79, %80 : vector<2x32xf32>
      %82 = math.tanh %81 : vector<2x32xf32>
      %83 = arith.mulf %78, %82 : vector<2x32xf32>
      %c0_45 = arith.constant 0 : index
      %c32 = arith.constant 32 : index
      %84 = vector.load %arg9[%c0_45, %c32] : memref<2x64xf32, #tpu.memory_space<vmem>>, vector<2x32xf32>
      tpu.vector_store %arg9[%c0_45, %c32], %83 {strides = array<i32>} : memref<2x64xf32, #tpu.memory_space<vmem>>, vector<2x32xf32>,
      %c0_46 = arith.constant 0 : index
      %c0_47 = arith.constant 0 : index
      %85 = vector.load %arg11[%c0_46, %c0_47] : memref<2x32xf32, #tpu.memory_space<vmem>>, vector<2x32xf32>
      tpu.vector_store %arg11[%c0_46, %c0_47], %81 {strides = array<i32>} : memref<2x32xf32, #tpu.memory_space<vmem>>, vector<2x32xf32>,
      %86 = arith.index_cast %17 : i32 to index
      %c0_48 = arith.constant 0 : index
      %87 = vector.load %arg7[%86, %c0_48] : memref<16x32xf32, #tpu.memory_space<vmem>>, vector<2x32xf32>
      tpu.vector_store %arg7[%86, %c0_48], %83 {strides = array<i32>} : memref<16x32xf32, #tpu.memory_space<vmem>>, vector<2x32xf32>,
    }
    %c8_i32_9 = arith.constant 8 : i32
    %c0_10 = arith.constant 0 : index
    %c0_11 = arith.constant 0 : index
    %11 = vector.load %arg7[%c0_10, %c0_11] : memref<16x32xf32, #tpu.memory_space<vmem>>, vector<16x32xf32>
    %c0_12 = arith.constant 0 : index
    %c0_13 = arith.constant 0 : index
    %12 = vector.load %arg1[%c0_12, %c0_13] : memref<16x32xf32, #tpu.memory_space<vmem>>, vector<16x32xf32>
    %13 = arith.addf %11, %12 : vector<16x32xf32>
    %c0_14 = arith.constant 0 : index
    %c0_15 = arith.constant 0 : index
    %14 = vector.load %arg7[%c0_14, %c0_15] : memref<16x32xf32, #tpu.memory_space<vmem>>, vector<16x32xf32>
    tpu.vector_store %arg7[%c0_14, %c0_15], %13 {strides = array<i32>} : memref<16x32xf32, #tpu.memory_space<vmem>>, vector<16x32xf32>,
    return
  }
  func.func @transform_0(%arg0: i32) -> (i32, i32) {
    %c0_i32 = arith.constant 0 : i32
    %c0_i32_0 = arith.constant 0 : i32
    return %arg0, %c0_i32 : i32, i32
  }
  func.func @transform_1(%arg0: i32) -> (i32, i32) {
    %c0_i32 = arith.constant 0 : i32
    %c0_i32_0 = arith.constant 0 : i32
    %c0_i32_1 = arith.constant 0 : i32
    return %c0_i32, %c0_i32_0 : i32, i32
  }
  func.func @transform_2(%arg0: i32) -> (i32, i32) {
    %c0_i32 = arith.constant 0 : i32
    %c0_i32_0 = arith.constant 0 : i32
    %c0_i32_1 = arith.constant 0 : i32
    return %c0_i32, %c0_i32_0 : i32, i32
  }
  func.func @transform_3(%arg0: i32) -> (i32, i32) {
    %c0_i32 = arith.constant 0 : i32
    %c0_i32_0 = arith.constant 0 : i32
    %c0_i32_1 = arith.constant 0 : i32
    return %c0_i32, %c0_i32_0 : i32, i32
  }
  func.func @transform_4(%arg0: i32) -> (i32, i32) {
    %c0_i32 = arith.constant 0 : i32
    %c0_i32_0 = arith.constant 0 : i32
    %c0_i32_1 = arith.constant 0 : i32
    return %c0_i32, %c0_i32_0 : i32, i32
  }
  func.func @transform_5(%arg0: i32) -> (i32, i32) {
    %c0_i32 = arith.constant 0 : i32
    %c0_i32_0 = arith.constant 0 : i32
    %c0_i32_1 = arith.constant 0 : i32
    return %c0_i32, %c0_i32_0 : i32, i32
  }
  func.func @transform_6(%arg0: i32) -> (i32, i32) {
    %c0_i32 = arith.constant 0 : i32
    %c0_i32_0 = arith.constant 0 : i32
    return %arg0, %c0_i32 : i32, i32
  }
}

</mosaic_0001>

<bundles_post_ra>
// kernel: tpu_custom_call.1
= control target key start
LH: loop header
LB: loop body
LE: loop exit
PB: predicated region body
PF: predicated region fallthrough
CT: control target
= control target key end

     0   :  { %11 = vsyncpa [#allocation7], 0  ;;  %s840_s0 = inlined_call_operand.hbm [shape: f32[16,32], index: 0, kind: input, shape index: {}]   ;;  %s841_s1 = inlined_call_operand.hbm [shape: f32[32,128], index: 1, kind: input, shape index: {}]   ;;  %s842_s2 = inlined_call_operand.hbm [shape: f32[32,128], index: 2, kind: input, shape index: {}]   ;;  %s843_s3 = inlined_call_operand.vmem [shape: f32[1,128], index: 3, kind: input, shape index: {}]   ;;  %s844_s4 = inlined_call_operand.hbm [shape: f32[64,128], index: 4, kind: input, shape index: {}]   ;;  %s845_s5 = inlined_call_operand.vmem [shape: f32[1,128], index: 5, kind: input, shape index: {}]   ;;  %s846_s6 = inlined_call_operand.hbm [shape: f32[16,32], index: 6, kind: output, shape index: {}]  }
   0x1   :  { %12 = vsyncpa [#allocation10], 0 }
   0x2   :  { %13 = vsyncpa [#allocation13], 0 }
   0x3   :  { %14 = vsyncpa [#allocation8], 0  ;;  %s707_s21 = smov [#allocation9]   ;;  %s708_s23 = smov [#allocation6]  }
   0x4   :  { %s32_s22 = sshll.u32 %s707_s21, 4  ;;  %s20_s24 = sshll.u32 %s708_s23, 4  ;;  %s33_s22 = int_to_ptr.vmem [resolvable:$true] %s32_s22  ;;  %s21_s24 = int_to_ptr.vmem [resolvable:$true] %s20_s24 }
   0x5   :  { %s599_s25 = scalar_lea.vmem %s33_s22, 512  ;;  %p604_p1 = scmp.lt.s32.totalorder %s33_s22, %s33_s22 }
   0x6   :  { %p600_p0 = scmp.ne.s32.totalorder %s33_s22, %s599_s25  ;;  %p605_p2 = scmp.lt.s32.totalorder %s599_s25, %s599_s25 }
   0x8   :  { %p606_p3 = por %p605_p2, %p604_p1 }
   0xa   :  { %p607_p4 = pnand %p606_p3, %p600_p0 }
   0xc   :  { %610 = shalt.err (!%p607_p4)
}
   0xd   :  { %s709_s26 = smov 128   ;;  %s710_s27 = smov 8  }
   0xe   :  { %38 = dma.hbm_to_vmem [thread:$0]  %s841_s1, 512, %s33_s22, [#allocation10], %s709_s26, %s709_s26, %s710_s27  }
   0xf   :  { %s619_s30 = scalar_lea.vmem %s21_s24, 256  ;;  %p624_p6 = scmp.lt.s32.totalorder %s21_s24, %s21_s24 }
  0x10   :  { %p620_p5 = scmp.ne.s32.totalorder %s21_s24, %s619_s30  ;;  %p625_p7 = scmp.lt.s32.totalorder %s619_s30, %s619_s30 }
  0x12   :  { %p626_p8 = por %p625_p7, %p624_p6 }
  0x14   :  { %p627_p9 = pnand %p626_p8, %p620_p5 }
  0x16   :  { %630 = shalt.err (!%p627_p9)
}
  0x17   :  { %26 = dma.hbm_to_vmem [thread:$0]  %s840_s0, 256, %s21_s24, [#allocation7], %s709_s26, %s709_s26, %s710_s27  }
  0x18   :  { %s711_s9 = smov [#allocation11]   ;;  %s712_s11 = smov [#allocation12]  }
  0x19   :  { %s44_s10 = sshll.u32 %s711_s9, 4  ;;  %s58_s12 = sshll.u32 %s712_s11, 4  ;;  %s45_s10 = int_to_ptr.vmem [resolvable:$true] %s44_s10  ;;  %s59_s12 = int_to_ptr.vmem [resolvable:$true] %s58_s12 }
  0x1a   :  { %s639_s1 = scalar_lea.vmem %s45_s10, 512  ;;  %p644_p11 = scmp.lt.s32.totalorder %s45_s10, %s45_s10 }
  0x1b   :  { %p640_p10 = scmp.ne.s32.totalorder %s45_s10, %s639_s1  ;;  %p645_p12 = scmp.lt.s32.totalorder %s639_s1, %s639_s1 }
  0x1d   :  { %p646_p13 = por %p645_p12, %p644_p11 }
  0x1f   :  { %p647_p0 = pnand %p646_p13, %p640_p10 }
  0x21   :  { %650 = shalt.err (!%p647_p0)
}
  0x22   :  { %50 = dma.hbm_to_vmem [thread:$0]  %s842_s2, 512, %s45_s10, [#allocation10], %s709_s26, %s709_s26, %s710_s27  }
  0x23   :  { %s659_s0 = scalar_lea.vmem %s59_s12, 1024  ;;  %p664_p2 = scmp.lt.s32.totalorder %s59_s12, %s59_s12 }
  0x24   :  { %p660_p1 = scmp.ne.s32.totalorder %s59_s12, %s659_s0  ;;  %p665_p3 = scmp.lt.s32.totalorder %s659_s0, %s659_s0 }
  0x26   :  { %p666_p4 = por %p665_p3, %p664_p2 }
  0x28   :  { %p667_p5 = pnand %p666_p4, %p660_p1 }
  0x2a   :  { %670 = shalt.err (!%p667_p5)
}
  0x2b   :  { %64 = dma.hbm_to_vmem [thread:$0]  %s844_s4, 1024, %s59_s12, [#allocation13], %s709_s26, %s709_s26, %s710_s27  }
  0x2c   :  { %695 = dma.done.wait [#allocation7], 256  }
  0x2d   :  { %696 = vsyncadd [#allocation7], 4294967040 }
  0x2e   :  { %697 = dma.done.wait [#allocation10], 1024  }
  0x2f   :  { %698 = vsyncadd [#allocation10], 4294966272 }
  0x30   :  { %699 = dma.done.wait [#allocation13], 1024  }
  0x31   :  { %700 = vsyncadd [#allocation13], 4294966272  ;;  %vm83_vm0 = vcmask 517120   ;;  %vm85_vm1 = vcmask 254976   ;;  %v713_v0 = vmov 0.0   ;;  %vm101_vm2 = vcmask 261120  }
  0x32   :  { %84 = vst.msk [vmem:[#allocation3] sm:$0x3] %vm83_vm0, %v713_v0  ;;  %v93_v1 = vld [vmem:[#allocation9 + $0x18] sm:$0xff]  ;;  %v92_v2 = vld [vmem:[#allocation9 + $0x10] sm:$0xff]  ;;  %v91_v4 = vld [vmem:[#allocation9 + $0x8] sm:$0xff]  ;;  %s786_s17 = smov 0  }
  0x33   :  { %86 = vst.msk [vmem:[#allocation4] sm:$0x3] %vm85_vm1, %v713_v0  ;;  %87 = vst.msk [vmem:[#allocation5] sm:$0x3] %vm85_vm1, %v713_v0  ;;  %513 = vmatprep.subr.mxu0 %v93_v1  ;;  %v88_v3 = vld [vmem:[#allocation6] sm:$0xff]  ;;  %v90_v5 = vld [vmem:[#allocation9] sm:$0xff] }
  0x34   :  { %514 = vmatpush3.msra.mxu0 %v93_v1  ;;  %521 = vmatprep.mubr.msk.f32.mxu0 %vm101_vm2, %v88_v3  ;;  %v89_v6 = vld [vmem:[#allocation6 + $0x8] sm:$0xff] }
  0x35   :  { %515 = vmatprep.subr.mxu0 %v92_v2  ;;  %v484_v7 = vld [vmem:[%s843_s3] ss:$0 sm:$0xff] }
  0x36   :  { %516 = vmatpush3.msra.mxu0 %v92_v2 }
  0x37   :  { %517 = vmatprep.subr.mxu0 %v91_v4 }
  0x38   :  { %518 = vmatpush3.msra.mxu0 %v91_v4 }
  0x39   :  { %519 = vmatprep.subr.mxu0 %v90_v5 }
  0x3a   :  { %520 = vmatpush3.msra.mxu0 %v90_v5 }
  0x3b   :  { %522 = vmatmul.mubr.msk.f32.vlgmr.msra.gmra.mxu0 %vm101_vm2, %v89_v6 }
  0xfb   :  { %v523_v8 = vpop.f32.mrf.mxu0 }
  0xfc   :  { %v180_v9 = vadd.f32 %v523_v8, %v484_v7 }
  0xfd   :  { %v174_v10 = vpop.f32.mrf.mxu0 }
  0xfe   :  { %184 = vst [vmem:[#allocation2 + $0x8] sm:$0xff] %v180_v9  ;;  %v175_v11 = vadd.f32 %v484_v7, %v174_v10 }
 0x100   :  { %183 = vst [vmem:[#allocation2] sm:$0xff] %v175_v11 }
 0x101 LB: > { %v198_v12 = vld [vmem:[#allocation11 + $0x18] sm:$0xff]  ;;  %v714_v13 = vmov 0.0   ;;  %v197_v14 = vld [vmem:[#allocation11 + $0x10] sm:$0xff]  ;;  %vm715_vm3 = vmmov 0   ;;  %v196_v15 = vld [vmem:[#allocation11 + $0x8] sm:$0xff]  ;;  %s487_s3 = sshll.u32 %s705_s17, 1  ;;  %s705_s17 = sphi %s786_s17, %s190_s17  }
 0x102   : > { %524 = vmatprep.subr.mxu0 %v714_v13  ;;  %532 = vmatprep.mubr.msk.f32.mxu0 %vm715_vm3, %v714_v13  ;;  %v195_v16 = vld [vmem:[#allocation11] sm:$0xff]  ;;  %v192_v17 = vld [vmem:[#allocation3] sm:$0x3]  ;;  %s193_s18 = scalar_lea.vmem [#allocation2], %s487_s3  ;;  %s716_s19 = smov 64   ;;  %v321_v34 = vld [vmem:[#allocation12 + $0x38] sm:$0xff] }
 0x103   : > { %525 = vmatpush3.msra.mxu0 %v198_v12  ;;  %535 = vmatprep.subr.mxu1 %v714_v13  ;;  %v273_v23 = vld [vmem:[#allocation4] sm:$0x3]  ;;  %s717_s20 = smov 32   ;;  %v320_v35 = vld [vmem:[#allocation12 + $0x30] sm:$0xff]  ;;  %v318_v37 = vld [vmem:[#allocation12 + $0x20] sm:$0xff]  ;;  %vm329_vm4 = vcmask 523264  }
 0x104   : > { %526 = vmatprep.subr.mxu0 %v714_v13  ;;  %551 = vmatprep.mubr.msk.f32.mxu1 %vm715_vm3, %v714_v13  ;;  %v319_v36 = vld [vmem:[#allocation12 + $0x28] sm:$0xff]  ;;  %v317_v39 = vld [vmem:[#allocation12 + $0x18] sm:$0xff]  ;;  %v316_v40 = vld [vmem:[#allocation12 + $0x10] sm:$0xff]  ;;  %s718_s23 = smov 96   ;;  %vm436_vm5 = vcmask 517376   ;;  %s446_s24 = scalar_lea.vmem [#allocation14], %s487_s3 }
 0x105   : > { %527 = vmatpush3.msra.mxu0 %v197_v14  ;;  %536 = vmatpush3.msra.mxu1 %v321_v34  ;;  %v315_v41 = vld [vmem:[#allocation12 + $0x8] sm:$0xff]  ;;  %v314_v42 = vld [vmem:[#allocation12] sm:$0xff]  ;;  %v490_v48 = vld [vmem:[%s845_s5] ss:$0 sm:$0xff]  ;;  %s190_s17 = sadd.s32 1, %s705_s17  }
 0x106   : > { %528 = vmatprep.subr.mxu0 %v714_v13  ;;  %537 = vmatprep.subr.mxu1 %v714_v13  ;;  %v403_v45 = vld [vmem:[#allocation5] sm:$0x3]  ;;  %p187_p6 = scmp.ge.s32.totalorder %s190_s17, 8  }
 0x107   : > { %529 = vmatpush3.msra.mxu0 %v196_v15  ;;  %v194_v18 = vld [vmem:[%s193_s18] sm:$0x3]  ;;  %538 = vmatpush3.msra.mxu1 %v320_v35  ;;  %v450_v7 = vld [vmem:[#allocation6] sm:$0xff] (%p187_p6)  ;;  %s719_s25 = smov (%p187_p6), [#allocation14]  }
 0x108   : > { %530 = vmatprep.subr.mxu0 %v714_v13  ;;  %539 = vmatprep.subr.mxu1 %v714_v13  ;;  %v451_v10 = vld [vmem:[#allocation6 + $0x8] sm:$0xff] (%p187_p6)  ;;  %s461_s28 = sshll.u32 (%p187_p6), %s719_s25, 4  ;;  %s462_s28 = int_to_ptr.vmem [resolvable:$true] %s461_s28 }
 0x109   : > { %531 = vmatpush3.msra.mxu0 %v195_v16  ;;  %540 = vmatpush3.msra.mxu1 %v319_v36  ;;  %s671_s29 = scalar_lea.vmem (%p187_p6), %s462_s28, 256  ;;  %p676_p8 = scmp.lt.s32.totalorder (%p187_p6), %s462_s28, %s462_s28 }
 0x10a   : > { %533 = vmatmul.mubr.msk.f32.vlgmr.msra.gmra.mxu0 %vm101_vm2, %v192_v17  ;;  %541 = vmatprep.subr.mxu1 %v714_v13  ;;  %p672_p7 = scmp.ne.s32.totalorder (%p187_p6), %s462_s28, %s671_s29  ;;  %p677_p9 = scmp.lt.s32.totalorder (%p187_p6), %s671_s29, %s671_s29 }
 0x10b   : > { %542 = vmatpush3.msra.mxu1 %v318_v37 }
 0x10c   : > { %543 = vmatprep.subr.mxu1 %v714_v13  ;;  %p678_p10 = por (%p187_p6), %p677_p9, %p676_p8 }
 0x10d   : > { %544 = vmatpush3.msra.mxu1 %v317_v39 }
 0x10e   : > { %545 = vmatprep.subr.mxu1 %v714_v13  ;;  %p679_p11 = pnand (%p187_p6), %p678_p10, %p672_p7 }
 0x10f   : > { %546 = vmatpush3.msra.mxu1 %v316_v40 }
 0x110   : > { %547 = vmatprep.subr.mxu1 %v714_v13 }
 0x111   : > { %548 = vmatpush3.msra.mxu1 %v315_v41 }
 0x112   : > { %549 = vmatprep.subr.mxu1 %v714_v13 }
 0x113   : > { %550 = vmatpush3.msra.mxu1 %v314_v42 }
 0x1ca   : > { %v268_v19 = vpop.f32.mrf.mxu0 }
 0x1cb   : > { %v272_v20 = vadd.f32 %v268_v19, %v194_v18 }
 0x1cc   : > { %v534_v21 = vpop.f32.mrf.mxu0 }
 0x1cd   : > { %575 = vtanh.f32 %v272_v20  ;;  %v489_v24 = vmul.f32 -1.442695, %v272_v20 }
 0x1cf   : > { %577 = vpow2.f32 %v489_v24 }
 0x1da   : > { %v576_v22 = vpop.eup %575 }
 0x1db   : > { %287 = vrot.lane.b32.xlu0 %v576_v22, %s716_s19 }
 0x1dc   : > { %v578_v25 = vpop.eup %577 }
 0x1dd   : > { %v277_v26 = vadd.f32 1.0, %v578_v25 }
 0x1df   : > { %282 = vrot.lane.b32.xlu0 %v273_v23, %s717_s20  ;;  %579 = vrcp.f32 %v277_v26 }
 0x1ec   : > { %v580_v27 = vpop.eup %579 }
 0x24d   : > { %v288_v28 = vpop.permute.xlu0 %287 }
 0x24e   : > { %v290_v29 = vmul.f32 %v580_v27, %v288_v28 }
 0x250   : > { %292 = vrot.lane.b32.xlu1 %v290_v29, %s717_s20 }
 0x251   : > { %v283_v30 = vpop.permute.xlu0 %282 }
 0x252   : > { %v285_v31 = vmul.f32 %v580_v27, %v283_v30 }
 0x2c2   : > { %v293_v32 = vpop.permute.xlu1 %292 }
 0x2c3   : > { %v295_v33 = vadd.f32 %v293_v32, %v285_v31 }
 0x2c5   : > { %581 = vtanh.f32 %v295_v33 }
 0x2d2   : > { %v582_v38 = vpop.eup %581 }
 0x2d3   : > { %298 = vrot.lane.b32.xlu1 %v582_v38, %s716_s19 }
 0x345   : > { %v299_v43 = vpop.permute.xlu1 %298 }
 0x346   : > { %v301_v44 = vmul.f32 %v580_v27, %v299_v43 }
 0x348   : > { %303 = vrot.lane.b32.xlu0 %v301_v44, %s717_s20 }
 0x34c   : > { %412 = vrot.lane.b32.xlu0 %v403_v45, %s717_s20 }
 0x3ba   : > { %v304_v46 = vpop.permute.xlu0 %303 }
 0x3bb   : > { %307 = vst.msk [vmem:[#allocation3] sm:$0x3] %vm85_vm1, %v304_v46 }
 0x3be   : > { %v413_v59 = vpop.permute.xlu0 %412 }
 0x3c2   : > { %v313_v47 = vld [vmem:[#allocation3] sm:$0x3] }
 0x3c3   : > { %552 = vmatmul.mubr.msk.f32.vlgmr.msra.gmra.mxu1 %vm329_vm4, %v313_v47 }
 0x483   : > { %v399_v49 = vpop.f32.mrf.mxu1 }
 0x484   : > { %v400_v50 = vadd.f32 %v490_v48, %v399_v49 }
 0x485   : > { %v553_v51 = vpop.f32.mrf.mxu1 }
 0x486   : > { %583 = vtanh.f32 %v400_v50  ;;  %v492_v53 = vmul.f32 -1.442695, %v400_v50 }
 0x488   : > { %585 = vpow2.f32 %v492_v53 }
 0x493   : > { %v584_v52 = vpop.eup %583 }
 0x494   : > { %417 = vrot.lane.b32.xlu1 %v584_v52, %s716_s19 }
 0x495   : > { %v586_v54 = vpop.eup %585 }
 0x496   : > { %v407_v55 = vadd.f32 1.0, %v586_v54 }
 0x498   : > { %587 = vrcp.f32 %v407_v55 }
 0x4a5   : > { %v588_v56 = vpop.eup %587 }
 0x4a6   : > { %v415_v60 = vmul.f32 %v588_v56, %v413_v59 }
 0x506   : > { %v418_v57 = vpop.permute.xlu1 %417 }
 0x507   : > { %v420_v58 = vmul.f32 %v588_v56, %v418_v57 }
 0x509   : > { %422 = vrot.lane.b32.xlu1 %v420_v58, %s717_s20 }
 0x50d   : > { %309 = vrot.lane.b32.xlu1 %v295_v33, %s718_s23 }
 0x57b   : > { %v423_v61 = vpop.permute.xlu1 %422 }
 0x57c   : > { %v425_v62 = vadd.f32 %v423_v61, %v415_v60 }
 0x57e   : > { %589 = vtanh.f32 %v425_v62  ;;  %439 = vrot.lane.b32.xlu1 %v425_v62, %s718_s23 }
 0x57f   : > { %v310_v63 = vpop.permute.xlu1 %309 }
 0x580   : > { %312 = vst.msk [vmem:[#allocation4] sm:$0x3] %vm85_vm1, %v310_v63 }
 0x58b   : > { %v590_v0 = vpop.eup %589 }
 0x58c   : > { %428 = vrot.lane.b32.xlu0 %v590_v0, %s716_s19 }
 0x5f0   : > { %v440_v1 = vpop.permute.xlu1 %439 }
 0x5f1   : > { %442 = vst.msk [vmem:[#allocation5] sm:$0x3] %vm85_vm1, %v440_v1 }
 0x5fe   : > { %v429_v2 = vpop.permute.xlu0 %428 }
 0x5ff   : > { %v431_v3 = vmul.f32 %v588_v56, %v429_v2 }
 0x601   : > { %433 = vrot.lane.b32.xlu0 %v431_v3, %s716_s19 }
 0x605   : > { %443 = vrot.lane.b32.xlu0 %v431_v3, %s717_s20 }
 0x673   : > { %v434_v4 = vpop.permute.xlu0 %433 }
 0x674   : > { %437 = vst.msk [vmem:[#allocation3] sm:$0x3] %vm436_vm5, %v434_v4 }
 0x677   : > { %v444_v5 = vpop.permute.xlu0 %443 }
 0x678   : > { %447 = vst.msk [vmem:[%s446_s24] sm:$0x3] %vm85_vm1, %v444_v5  ;;  %189 = sbr.rel (!%p187_p6) target bundleno = 257 (0x101), region = 73 }
 0x67f   :  { %v448_v6 = vld [vmem:[#allocation14] sm:$0xff]  ;;  %v449_v8 = vld [vmem:[#allocation14 + $0x8] sm:$0xff] }
 0x680   :  { %v452_v9 = vadd.f32 %v450_v7, %v448_v6  ;;  %v453_v11 = vadd.f32 %v451_v10, %v449_v8 }
 0x682   :  { %454 = vst.msk [vmem:[#allocation14] sm:$0xff] %vm101_vm2, %v452_v9  ;;  %455 = vst.msk [vmem:[#allocation14 + $0x8] sm:$0xff] %vm101_vm2, %v453_v11 }
 0x683   :  { %682 = shalt.err (!%p679_p11)
}
 0x684   :  { %467 = dma.vmem_to_hbm [thread:$0]  %s462_s28, 256, %s846_s6, [#allocation8], %s709_s26, %s709_s26, %s710_s27  }
 0x685   :  { %701 = dma.done.wait [#allocation8], 256  }
 0x686   :  { %702 = vsyncadd [#allocation8], 4294967040 }
 0x687   :  { %471 = vsyncpa [#allocation7], 1 }
 0x688   :  { %472 = vsyncpa [#allocation10], 1 }
 0x689   :  { %473 = vsyncpa [#allocation13], 1 }
 0x68a   :  { %474 = vsyncpa [#allocation8], 1 }

</bundles_post_ra>
